<compile_context>
chip_gen: v7x
topology: tpu7x:2x2x1
jax: 0.10.0
libtpu: 0.0.40
codegen_flags: <defaults>
</compile_context>

<pallas_src>
import jax
import jax.numpy as jnp
from jax.experimental import pallas as pl
from jax.experimental.pallas import tpu as pltpu


# ----------------------------- Pallas kernel -------------------------------
def _tplink_pair_kernel(it_ref, jt_ref,   # scalar-prefetch tile tables (SMEM)
                        a_ref,            # (1, T, H)  f32   A rows of i-tile
                        bv_ref,           # (1, T, H)  f32   Bv rows of j-tile (b_combine folded)
                        wh_ref,           # (H, N_PAD) bf16  fused [ent | head_r | tail_r]
                        bh_ref,           # (1, N_PAD) f32   fused bias
                        out_ref):         # (1, 1, T*T, N_PAD) bf16
    del it_ref, jt_ref                    # only used by the index maps
    t, h = a_ref.shape[1], a_ref.shape[2]

    a = a_ref[0]                                        # (T, H) f32
    bv = bv_ref[0]                                      # (T, H) f32
    # Pair pre-activation: pre[ii, jj, :] = A[ii] + Bv[jj]  (sublane / outer
    # broadcasts; no concatenate, no giant unrolled basic block).
    pre = a[:, None, :] + bv[None, :, :]                # (T, T, H) f32
    # HandshakingKernel "cat": tanh(cat(h_i, h_j) @ W_combine + b), f32 tanh.
    # TODO(synk): on v6e/v7x the tanh could be done in bf16 to halve EUP pushes.
    shaking = jnp.tanh(pre).astype(jnp.bfloat16).reshape(t * t, h)
    # Fused ent/head/tail heads: single lane-dense matmul, f32 accumulation.
    out = jnp.dot(shaking, wh_ref[...], preferred_element_type=jnp.float32)
    out_ref[0, 0] = (out + bh_ref[...]).astype(out_ref.dtype)


# ------------------------------ wrapper -------------------------------------
def _choose_tile(S, H):
    """Tile size T (multiple of 8) for both the i and j axes.

    Keeps the per-step f32 pre-slab (T*T*H*4 bytes) at a few MiB (fits the
    v7x 64 MiB VMEM / scoped defaults with margin) while making T*T pair rows
    per step large enough to amortize the ~0.35us per-step overhead."""
    budget = 8 * 1024 * 1024
    t = 8
    for cand in (16, 32, 64):
        if S >= cand and cand * cand * H * 4 <= budget:
            t = cand
    return t


def tplink_heads(last_hidden, params):
    """last_hidden: (B,S,H) f32 -> (ent (B,P,2), head (B,R,P,3), tail (B,R,P,3))."""
    B, S, H = last_hidden.shape
    R = params["w_head"].shape[0]
    N = 2 + 6 * R
    N_PAD = ((N + 127) // 128) * 128

    T = _choose_tile(S, H)
    S_pad = ((S + T - 1) // T) * T
    NT = S_pad // T

    # --- per-token combine projections, hoisted out of the kernel grid ------
    lh = last_hidden
    if S_pad != S:
        lh = jnp.pad(lh, ((0, 0), (0, S_pad - S), (0, 0)))  # pad rows never gathered
    lh_bf = lh.astype(jnp.bfloat16)
    w12 = jnp.concatenate([params["w_combine1"], params["w_combine2"]],
                          axis=1).astype(jnp.bfloat16)              # (H, 2H)
    ab = jnp.dot(lh_bf, w12, preferred_element_type=jnp.float32)    # (B, S_pad, 2H)
    a_proj = ab[..., :H]                                            # (B, S_pad, H) f32
    bv_proj = ab[..., H:] + params["b_combine"].astype(jnp.float32)  # fold b_combine

    # --- fuse ent/head/tail weights into one lane-dense (H, N_PAD) matrix ---
    w_heads = jnp.concatenate(
        [params["w_ent"],                                           # (H, 2)
         params["w_head"].transpose(1, 0, 2).reshape(H, 3 * R),     # (H, 3R)
         params["w_tail"].transpose(1, 0, 2).reshape(H, 3 * R)],    # (H, 3R)
        axis=1)
    w_heads = jnp.pad(w_heads, ((0, 0), (0, N_PAD - N))).astype(jnp.bfloat16)
    b_heads = jnp.concatenate(
        [params["b_ent"].reshape(-1),
         params["b_head"].reshape(-1),
         params["b_tail"].reshape(-1)])
    b_heads = jnp.pad(b_heads, (0, N_PAD - N)).astype(jnp.float32).reshape(1, N_PAD)

    # --- upper-triangular tile-pair enumeration (scalar prefetch tables) ----
    ti_idx, tj_idx = jnp.triu_indices(NT)         # row-major: it <= jt
    it_tbl = ti_idx.astype(jnp.int32)
    jt_tbl = tj_idx.astype(jnp.int32)
    G = int(it_tbl.shape[0])                      # NT*(NT+1)//2 tile pairs

    grid_spec = pltpu.PrefetchScalarGridSpec(
        num_scalar_prefetch=2,
        grid=(B, G),
        in_specs=[
            pl.BlockSpec((1, T, H), lambda b, g, it, jt: (b, it[g], 0)),   # A i-tile
            pl.BlockSpec((1, T, H), lambda b, g, it, jt: (b, jt[g], 0)),   # Bv j-tile
            pl.BlockSpec((H, N_PAD), lambda b, g, it, jt: (0, 0)),         # fused heads W
            pl.BlockSpec((1, N_PAD), lambda b, g, it, jt: (0, 0)),         # fused heads b
        ],
        out_specs=pl.BlockSpec((1, 1, T * T, N_PAD),
                               lambda b, g, it, jt: (b, g, 0, 0)),
    )

    out_full = pl.pallas_call(
        _tplink_pair_kernel,
        out_shape=jax.ShapeDtypeStruct((B, G, T * T, N_PAD), jnp.bfloat16),
        grid_spec=grid_spec,
        compiler_params=pltpu.CompilerParams(
            dimension_semantics=("parallel", "parallel"),
            vmem_limit_bytes=48 * 1024 * 1024),
    )(it_tbl, jt_tbl, a_proj, bv_proj, w_heads, b_heads)

    # --- gather compacted upper-tri tiles into TPLinker pair order ----------
    # TPLinker order: (0,0),(0,1),...,(0,S-1),(1,1),...,(S-1,S-1)
    ii, jj = jnp.triu_indices(S)
    it = ii // T
    jt = jj // T
    g = it * NT - (it * (it - 1)) // 2 + (jt - it)       # tile-pair index (row-major triu)
    row = (ii % T) * T + (jj % T)                        # row within the (T*T, N) tile
    pair_flat = (g * (T * T) + row).astype(jnp.int32)
    P = int(pair_flat.shape[0])

    out_flat = out_full.reshape(B, G * T * T, N_PAD)[..., :N]
    out_pairs = jnp.take(out_flat, pair_flat, axis=1).astype(jnp.float32)   # (B, P, N)
    ent = out_pairs[:, :, :2]
    head = out_pairs[:, :, 2:2 + 3 * R].reshape(B, P, R, 3).transpose(0, 2, 1, 3)
    tail = out_pairs[:, :, 2 + 3 * R:].reshape(B, P, R, 3).transpose(0, 2, 1, 3)
    return ent, head, tail


def bert_embed_stub(input_ids, attention_mask, token_type_ids, params):
    # TODO(synk): BertModel.from_pretrained (full transformer encoder stack +
    # checkpoint) has no self-contained equivalent here; this stub reproduces
    # the BERT embedding layer (word + position + token_type embeddings +
    # LayerNorm) to supply last_hidden_state with the same (B, S, H) contract.
    del attention_mask
    B, S = input_ids.shape
    h = (params["word_emb"][input_ids]
         + params["pos_emb"][jnp.arange(S)][None, :, :]
         + params["type_emb"][token_type_ids])
    mu = h.mean(-1, keepdims=True)
    var = h.var(-1, keepdims=True)
    h = (h - mu) * jax.lax.rsqrt(var + 1e-12)
    return h * params["ln_gamma"] + params["ln_beta"]


def bert_tplink_v2_forward(input_ids, attention_mask, token_type_ids, params):
    last_hidden_state = bert_embed_stub(input_ids, attention_mask,
                                        token_type_ids, params)
    return tplink_heads(last_hidden_state, params)


# ------------------------------ reference -----------------------------------
def _reference_heads(last_hidden, params):
    B, S, H = last_hidden.shape
    idx_i, idx_j = [], []
    for i in range(S):
        for j in range(i, S):
            idx_i.append(i)
            idx_j.append(j)
    rep = last_hidden[:, jnp.asarray(idx_i), :]
    vis = last_hidden[:, jnp.asarray(idx_j), :]
    shaking = jnp.tanh(rep @ params["w_combine1"] + vis @ params["w_combine2"]
                       + params["b_combine"])
    ent = shaking @ params["w_ent"] + params["b_ent"]
    head = jnp.einsum("bph,rhk->brpk", shaking, params["w_head"]) \
        + params["b_head"][None, :, None, :]
    tail = jnp.einsum("bph,rhk->brpk", shaking, params["w_tail"]) \
        + params["b_tail"][None, :, None, :]
    return ent, head, tail


# ------------------------------ main -----------------------------------------
if __name__ == "__main__":
    # small config implied by the module
    B, S, H, R = 2, 8, 32, 2          # batch, seq_len, hidden_size, rel_size
    VOCAB, MAX_POS, TYPE_VOCAB = 64, 64, 2

    key = jax.random.PRNGKey(0)
    ks = jax.random.split(key, 16)

    params = {
        # BERT embedding stub parameters
        "word_emb": 0.1 * jax.random.normal(ks[0], (VOCAB, H), jnp.float32),
        "pos_emb": 0.1 * jax.random.normal(ks[1], (MAX_POS, H), jnp.float32),
        "type_emb": 0.1 * jax.random.normal(ks[2], (TYPE_VOCAB, H), jnp.float32),
        "ln_gamma": jnp.ones((H,), jnp.float32),
        "ln_beta": jnp.zeros((H,), jnp.float32),
        # HandshakingKernel combine_fc Linear(2H, H) split: W1 (h_i), W2 (h_j)
        "w_combine1": 0.1 * jax.random.normal(ks[3], (H, H), jnp.float32),
        "w_combine2": 0.1 * jax.random.normal(ks[4], (H, H), jnp.float32),
        "b_combine": 0.1 * jax.random.normal(ks[5], (1, H), jnp.float32),
        # ent_fc: Linear(H, 2)
        "w_ent": 0.1 * jax.random.normal(ks[6], (H, 2), jnp.float32),
        "b_ent": 0.1 * jax.random.normal(ks[7], (1, 2), jnp.float32),
        # rel_size x Linear(H, 3) head / tail
        "w_head": 0.1 * jax.random.normal(ks[8], (R, H, 3), jnp.float32),
        "b_head": 0.1 * jax.random.normal(ks[9], (R, 3), jnp.float32),
        "w_tail": 0.1 * jax.random.normal(ks[10], (R, H, 3), jnp.float32),
        "b_tail": 0.1 * jax.random.normal(ks[11], (R, 3), jnp.float32),
    }

    input_ids = jax.random.randint(ks[12], (B, S), 0, VOCAB, jnp.int32)
    attention_mask = jnp.ones((B, S), jnp.int32)
    token_type_ids = jnp.zeros((B, S), jnp.int32)

    ent, head_rel, tail_rel = bert_tplink_v2_forward(
        input_ids, attention_mask, token_type_ids, params)
    jax.block_until_ready((ent, head_rel, tail_rel))

    # sanity-check against a plain-JAX f32 reference of handshaking + heads
    # (kernel uses bf16 MXU operands + bf16 output slab -> loosened tolerance)
    last_hidden = bert_embed_stub(input_ids, attention_mask, token_type_ids, params)
    ent_r, head_r, tail_r = _reference_heads(last_hidden, params)
    P = S * (S + 1) // 2
    assert ent.shape == (B, P, 2)
    assert head_rel.shape == (B, R, P, 3)
    assert tail_rel.shape == (B, R, P, 3)
    assert jnp.allclose(ent, ent_r, atol=4e-2, rtol=4e-2)
    assert jnp.allclose(head_rel, head_r, atol=4e-2, rtol=4e-2)
    assert jnp.allclose(tail_rel, tail_r, atol=4e-2, rtol=4e-2)

    print("KERNEL_OK")
</pallas_src>

<mosaic_0001>
module attributes {stable_mosaic.version = 11 : i64} {
  func.func @_tplink_pair_kernel(%arg0: i32, %arg1: i32, %arg2: memref<1xi32, #tpu.memory_space<smem>>, %arg3: memref<1xi32, #tpu.memory_space<smem>>, %arg4: memref<1x8x32xf32, #tpu.memory_space<vmem>>, %arg5: memref<1x8x32xf32, #tpu.memory_space<vmem>>, %arg6: memref<32x128xbf16, #tpu.memory_space<vmem>>, %arg7: memref<1x128xf32, #tpu.memory_space<vmem>>, %arg8: memref<1x1x64x128xbf16, #tpu.memory_space<vmem>>) attributes {dimension_semantics = [#tpu.dimension_semantics<parallel>, #tpu.dimension_semantics<parallel>], iteration_bounds = array<i64: 2, 1>, scalar_prefetch = 2 : i64, scratch_operands = 0 : i64, tpu.core_type = #tpu.core_type<tc>, window_params = [{transform_indices = @transform_0, window_bounds = array<i64: 1, 8, 32>}, {transform_indices = @transform_1, window_bounds = array<i64: 1, 8, 32>}, {pipeline_mode = #tpu.pipeline_mode<synchronous>, transform_indices = @transform_2, window_bounds = array<i64: 32, 128>}, {pipeline_mode = #tpu.pipeline_mode<synchronous>, transform_indices = @transform_3, window_bounds = array<i64: 1, 128>}, {transform_indices = @transform_4, window_bounds = array<i64: 1, 1, 64, 128>}]} {
    %c0 = arith.constant 0 : index
    %c0_0 = arith.constant 0 : index
    %c0_1 = arith.constant 0 : index
    %0 = vector.load %arg4[%c0, %c0_0, %c0_1] : memref<1x8x32xf32, #tpu.memory_space<vmem>>, vector<1x8x32xf32>
    %1 = vector.shape_cast %0 : vector<1x8x32xf32> to vector<8x32xf32>
    %c0_2 = arith.constant 0 : index
    %c0_3 = arith.constant 0 : index
    %c0_4 = arith.constant 0 : index
    %2 = vector.load %arg5[%c0_2, %c0_3, %c0_4] : memref<1x8x32xf32, #tpu.memory_space<vmem>>, vector<1x8x32xf32>
    %3 = vector.shape_cast %2 : vector<1x8x32xf32> to vector<8x32xf32>
    %4 = vector.shape_cast %1 : vector<8x32xf32> to vector<8x1x32xf32>
    %5 = vector.shape_cast %3 : vector<8x32xf32> to vector<1x8x32xf32>
    %6 = vector.broadcast %4 : vector<8x1x32xf32> to vector<8x8x32xf32>
    %7 = vector.broadcast %5 : vector<1x8x32xf32> to vector<8x8x32xf32>
    %8 = arith.addf %6, %7 : vector<8x8x32xf32>
    %9 = math.tanh %8 : vector<8x8x32xf32>
    %10 = arith.truncf %9 : vector<8x8x32xf32> to vector<8x8x32xbf16>
    %11 = vector.shape_cast %10 : vector<8x8x32xbf16> to vector<64x32xbf16>
    %c0_5 = arith.constant 0 : index
    %c0_6 = arith.constant 0 : index
    %12 = vector.load %arg6[%c0_5, %c0_6] : memref<32x128xbf16, #tpu.memory_space<vmem>>, vector<32x128xbf16>
    %cst = arith.constant dense<0.000000e+00> : vector<64x128xf32>
    %13 = tpu.matmul %11, %12, %cst {dimension_numbers = #tpu.dot_dimension_numbers<[1], [0], [0], [1], [0, 0, 1, 1], [], []>} : vector<64x32xbf16>, vector<32x128xbf16>, vector<64x128xf32> -> vector<64x128xf32>
    %c0_7 = arith.constant 0 : index
    %c0_8 = arith.constant 0 : index
    %14 = vector.load %arg7[%c0_7, %c0_8] : memref<1x128xf32, #tpu.memory_space<vmem>>, vector<1x128xf32>
    %15 = vector.broadcast %14 : vector<1x128xf32> to vector<64x128xf32>
    %16 = arith.addf %13, %15 : vector<64x128xf32>
    %17 = arith.truncf %16 : vector<64x128xf32> to vector<64x128xbf16>
    %c0_9 = arith.constant 0 : index
    %c0_10 = arith.constant 0 : index
    %c0_11 = arith.constant 0 : index
    %c0_12 = arith.constant 0 : index
    %18 = vector.load %arg8[%c0_9, %c0_10, %c0_11, %c0_12] : memref<1x1x64x128xbf16, #tpu.memory_space<vmem>>, vector<1x1x64x128xbf16>
    %19 = vector.shape_cast %18 : vector<1x1x64x128xbf16> to vector<64x128xbf16>
    %20 = vector.shape_cast %17 : vector<64x128xbf16> to vector<1x1x64x128xbf16>
    tpu.vector_store %arg8[%c0_9, %c0_10, %c0_11, %c0_12], %20 {strides = array<i32>} : memref<1x1x64x128xbf16, #tpu.memory_space<vmem>>, vector<1x1x64x128xbf16>,
    return
  }
  func.func @transform_0(%arg0: i32, %arg1: i32, %arg2: memref<1xi32, #tpu.memory_space<smem>>, %arg3: memref<1xi32, #tpu.memory_space<smem>>) -> (i32, i32, i32) {
    %0 = arith.index_cast %arg1 : i32 to index
    %1 = memref.load %arg2[%0] : memref<1xi32, #tpu.memory_space<smem>>
    %c0_i32 = arith.constant 0 : i32
    %c0_i32_0 = arith.constant 0 : i32
    return %arg0, %1, %c0_i32 : i32, i32, i32
  }
  func.func @transform_1(%arg0: i32, %arg1: i32, %arg2: memref<1xi32, #tpu.memory_space<smem>>, %arg3: memref<1xi32, #tpu.memory_space<smem>>) -> (i32, i32, i32) {
    %0 = arith.index_cast %arg1 : i32 to index
    %1 = memref.load %arg3[%0] : memref<1xi32, #tpu.memory_space<smem>>
    %c0_i32 = arith.constant 0 : i32
    %c0_i32_0 = arith.constant 0 : i32
    return %arg0, %1, %c0_i32 : i32, i32, i32
  }
  func.func @transform_2(%arg0: i32, %arg1: i32, %arg2: memref<1xi32, #tpu.memory_space<smem>>, %arg3: memref<1xi32, #tpu.memory_space<smem>>) -> (i32, i32) {
    %c0_i32 = arith.constant 0 : i32
    %c0_i32_0 = arith.constant 0 : i32
    %c0_i32_1 = arith.constant 0 : i32
    return %c0_i32, %c0_i32_0 : i32, i32
  }
  func.func @transform_3(%arg0: i32, %arg1: i32, %arg2: memref<1xi32, #tpu.memory_space<smem>>, %arg3: memref<1xi32, #tpu.memory_space<smem>>) -> (i32, i32) {
    %c0_i32 = arith.constant 0 : i32
    %c0_i32_0 = arith.constant 0 : i32
    %c0_i32_1 = arith.constant 0 : i32
    return %c0_i32, %c0_i32_0 : i32, i32
  }
  func.func @transform_4(%arg0: i32, %arg1: i32, %arg2: memref<1xi32, #tpu.memory_space<smem>>, %arg3: memref<1xi32, #tpu.memory_space<smem>>) -> (i32, i32, i32, i32) {
    %c0_i32 = arith.constant 0 : i32
    %c0_i32_0 = arith.constant 0 : i32
    %c0_i32_1 = arith.constant 0 : i32
    return %arg0, %arg1, %c0_i32, %c0_i32_0 : i32, i32, i32, i32
  }
}

</mosaic_0001>

<bundles_post_ra>
// kernel: tpu_custom_call.1
= control target key start
LH: loop header
LB: loop body
LE: loop exit
PB: predicated region body
PF: predicated region fallthrough
CT: control target
= control target key end

     0   :  { %s1582_s0 = inlined_call_operand.<no memory space> [shape: s32[1], index: 0, kind: input, shape index: {}]   ;;  %s1583_s1 = inlined_call_operand.<no memory space> [shape: s32[1], index: 1, kind: input, shape index: {}]   ;;  %s1584_s2 = inlined_call_operand.hbm [shape: f32[2,8,32], index: 2, kind: input, shape index: {}]   ;;  %s1585_s3 = inlined_call_operand.hbm [shape: f32[2,8,32], index: 3, kind: input, shape index: {}]   ;;  %s1586_s4 = inlined_call_operand.hbm [shape: bf16[32,128], index: 4, kind: input, shape index: {}]   ;;  %s1587_s5 = inlined_call_operand.vmem [shape: f32[1,128], index: 5, kind: input, shape index: {}]   ;;  %s1588_s6 = inlined_call_operand.hbm [shape: bf16[2,1,64,128], index: 6, kind: output, shape index: {}]  }
   0x1   :  { %1601 = sst [smem:[#allocation21_spill]] %s1586_s4 }
   0x2   :  { %1602 = sst [smem:[#allocation22_spill]] %s1588_s6 }
   0x3   :  { %11 = sst [smem:[#allocation3]] %s1582_s0 }
   0x4   :  { %12 = sst [smem:[#allocation4]] %s1583_s1 }
   0x5   :  { %13 = vsyncpa [#allocation6], 0 }
   0x6   :  { %15 = vsyncpa [#allocation6 + $0x1], 0 }
   0x7   :  { %16 = vsyncpa [#allocation9], 0 }
   0x8   :  { %18 = vsyncpa [#allocation9 + $0x1], 0 }
   0x9   :  { %19 = vsyncpa [#allocation7], 0 }
   0xa   :  { %21 = vsyncpa [#allocation7 + $0x1], 0  ;;  %s1232_s25 = smov 0   ;;  %s1234_s26 = smov 0  }
   0xb   :  { %s1236_s27 = smov 0   ;;  %s1238_s28 = smov 0  }
   0xc   :  { %s1240_s29 = smov 0   ;;  %s1242_s0 = smov 0  }
   0xd   :  { %s1244_s30 = smov 0   ;;  %s1246_s1 = smov 0  }
   0xe   :  { %s1248_s7 = smov 0   ;;  %s1250_s8 = smov 0  }
   0xf   :  { %s1252_s9 = smov 0   ;;  %s1254_s10 = smov 0  }
  0x10 LB: > { %1603 = sst [smem:[#allocation16_spill]] %s1136_s25  ;;  %s1293_s11 = sadd.s32 4294967295, %s1180_s10   ;;  %s1180_s10 = sphi %s1254_s10, %s27_s10   ;;  %s1176_s9 = sphi %s1252_s9, %s1648_s9   ;;  %s1172_s8 = sphi %s1250_s8, %s1647_s8   ;;  %s1168_s7 = sphi %s1248_s7, %s1646_s7   ;;  %s1164_s1 = sphi %s1246_s1, %s1645_s1   ;;  %s1160_s30 = sphi %s1244_s30, %s1644_s30   ;;  %s1156_s0 = sphi %s1242_s0, %s1643_s0   ;;  %s1152_s29 = sphi %s1240_s29, %s1642_s29   ;;  %s1148_s28 = sphi %s1238_s28, %s1641_s28   ;;  %s1144_s27 = sphi %s1236_s27, %s1640_s27   ;;  %s1140_s26 = sphi %s1234_s26, %s1639_s26   ;;  %s1136_s25 = sphi %s1232_s25, %s1638_s25  }
  0x11   : > { %1604 = sst [smem:[#allocation17_spill]] %s1172_s8  ;;  %s709_s12 = sadd.s32 4294967294, %s1180_s10  }
  0x12   : > { %p1589_p0 = scmp.eq.s32.totalorder %s1293_s11, 0  ;;  %p160_p1 = scmp.ne.s32.totalorder %s1144_s27, %s1140_s26 }
  0x13   : > { %p161_p2 = scmp.eq.s32.totalorder %s1293_s11, 1  ;;  %p166_p3 = scmp.ne.s32.totalorder %s1140_s26, %s1136_s25 }
  0x14   : > { %p167_p4 = scmp.eq.s32.totalorder %s709_s12, 1  ;;  %p710_p5 = scmp.ge.s32.totalorder %s1180_s10, 1 }
  0x15   : > { %p1303_p6 = por %p161_p2, %p160_p1  ;;  %p174_p7 = scmp.lt.s32.totalorder %s1180_s10, 3 }
  0x16   : > { %p1308_p8 = por %p167_p4, %p166_p3  ;;  %s1182_s16 = smov [#allocation10]  }
  0x17   : > { %s1605_s13 = scalar_select %p1303_p6, 1, 0 }
  0x18   : > { %s1607_s14 = scalar_select %p1308_p8, 1, 0 }
  0x19   : > { %1606 = sst [smem:[#allocation18_spill]] %s1605_s13  ;;  %p1312_p9 = pnand %p710_p5, %p174_p7 }
  0x1a   : > { %1608 = sst [smem:[#allocation19_spill]] %s1607_s14  ;;  %s186_s17 = sshll.u32 %s1182_s16, 4  ;;  %s187_s17 = int_to_ptr.vmem [resolvable:$true] %s186_s17 }
  0x1b   : > { %s1609_s15 = scalar_select %p1312_p9, 1, 0 }
  0x1c   : > { %p814_p10 = pneg %p1312_p9  ;;  %s1611_s4 = sld [smem:[#allocation21_spill]] }
  0x1e   : > { %p1321_p12 = pnand %p814_p10, %p1589_p0 }
  0x20   : > { %p956_p1 = pneg %p1321_p12 }
  0x22   : > { %s954_s21 = scalar_lea.hbm %s1611_s4, 256 }
  0x23   : > { %p955_p13 = scmp.ne.s32.totalorder %s1611_s4, %s954_s21  ;;  %p961_p4 = scmp.lt.u32.totalorder %s954_s21, %s1611_s4 }
  0x25   : > { %p957_p2 = pnand %p956_p1, %p955_p13 }
  0x27   : > { %p958_p3 = pneg %p957_p2 }
  0x29   : > { %p963_p5 = pnand %p961_p4, %p958_p3 }
  0x2b   : > { %966 = shalt.err (!%p963_p5)
}
  0x2c   : > { %s967_s16 = scalar_lea.vmem %s187_s17, 256  ;;  %p975_p0 = scmp.lt.s32.totalorder %s187_s17, %s187_s17 }
  0x2d   : > { %p968_p7 = scmp.ne.s32.totalorder %s187_s17, %s967_s16  ;;  %p976_p8 = scmp.lt.s32.totalorder %s967_s16, %s967_s16 }
  0x2f   : > { %p970_p10 = pnand %p968_p7, %p956_p1  ;;  %p977_p6 = por %p976_p8, %p975_p0 }
  0x31   : > { %p971_p11 = pneg %p970_p10 }
  0x33   : > { %p978_p9 = pnand %p977_p6, %p971_p11 }
  0x35   : > { %981 = shalt.err (!%p978_p9)
}
  0x36   : > { %s1183_s19 = smov 64   ;;  %s1184_s20 = smov 4  }
  0x37   : > { %817 = dma.hbm_to_vmem [thread:$0]  (!%p1321_p12), %s1611_s4, 256, %s187_s17, [#allocation9], %s1183_s19, %s1183_s19, %s1184_s20  }
  0x38   : > { %s39_s23 = sadd.s32 1, %s1176_s9  ;;  %s43_s24 = sld [smem:[#allocation3]] }
  0x39   : > { %p41_p0 = scmp.ge.s32.totalorder %s39_s23, 2  ;;  %s50_s12 = sadd.s32 1, %s1168_s7 }
  0x3a   : > { %p57_p6 = scmp.ne.s32.totalorder %s1168_s7, %s1164_s1  ;;  %p1599_p8 = scmp.eq.s32.totalorder %s1180_s10, 0 }
  0x3b   : > { %s1650_s23 = smov (%p41_p0, %s39_s23), 0  ;;  %p63_p11 = scmp.ne.s32.totalorder %s1164_s1, %s1160_s30 }
  0x3c   : > { %1612 = sst [smem:[#allocation20_spill]] %s1650_s23  ;;  %p1350_p9 = por %p1599_p8, %p57_p6 }
  0x3d   : > { %s45_s17 = ssub.s32 %s1176_s9, %s1650_s23  ;;  %s1358_s16 = sld [smem:[#allocation4]] }
  0x3e   : > { %p1614_p12 = scmp.eq.s32.totalorder %s1293_s11, 0  ;;  %p1366_p1 = scmp.eq.s32.totalorder %s45_s17, 0 }
  0x3f   : > { %s150_s21 = sadd.s32 1, %s1144_s27  ;;  %p1598_p2 = scmp.lt.s32.totalorder %s1180_s10, 2 }
  0x40   : > { %p1362_p13 = por %p1614_p12, %p63_p11  ;;  %s203_s4 = sand.u32 1, %s1168_s7  }
  0x41   : > { %s1374_s22 = scalar_select %p1366_p1, %s1144_s27, %s150_s21  }
  0x42   : > { %s1615_s19 = scalar_select %p1362_p13, 1, 0 }
  0x43   : > { %s1379_s30 = scalar_select %p1366_p1, %s1168_s7, %s50_s12  }
  0x44   : > { %s713_s23 = sshll.u32 %s203_s4, 3  ;;  %s212_s14 = sadd.s32 %s1176_s9, %s43_s24 }
  0x45   : > { %s714_s25 = sshll.u32 %s212_s14, 7  ;;  %s207_s8 = scalar_lea.vmem [#allocation5], %s713_s23 }
  0x46   : > { %s1387_s17 = scalar_lea.hbm %s1584_s2, %s714_s25  ;;  %s216_s21 = sshll.u32 %s207_s8, 4  ;;  %s1389_s21 = int_to_ptr.vmem [resolvable:$true] %s216_s21 }
  0x47   : > { %p1395_p3 = pnand %p1598_p2, %p1350_p9  ;;  %s204_s14 = scalar_lea.sflag [#allocation6], %s203_s4 }
  0x48   : > { %s982_s6 = scalar_lea.hbm %s1387_s17, 128  ;;  %s987_s13 = scalar_lea.hbm %s1584_s2, 256 }
  0x49   : > { %p983_p4 = scmp.ne.s32.totalorder %s1387_s17, %s982_s6  ;;  %p984_p5 = pneg %p1395_p3 }
  0x4a   : > { %p988_p0 = scmp.lt.u32.totalorder %s1387_s17, %s1584_s2  ;;  %p989_p6 = scmp.lt.u32.totalorder %s987_s13, %s982_s6 }
  0x4b   : > { %p985_p7 = pnand %p984_p5, %p983_p4  ;;  %p991_p11 = scmp.lt.u32.totalorder %s982_s6, %s1387_s17 }
  0x4c   : > { %p990_p9 = por %p989_p6, %p988_p0 }
  0x4d   : > { %p986_p10 = pneg %p985_p7 }
  0x4e   : > { %p992_p12 = por %p991_p11, %p990_p9 }
  0x50   : > { %p993_p2 = pnand %p992_p12, %p986_p10 }
  0x52   : > { %996 = shalt.err (!%p993_p2)
}
  0x53   : > { %s997_s4 = scalar_lea.vmem %s1389_s21, 128  ;;  %s1185_s18 = smov [#allocation5]  }
  0x54   : > { %p998_p4 = scmp.ne.s32.totalorder %s1389_s21, %s997_s4  ;;  %s1002_s25 = sshll.u32 %s1185_s18, 4  ;;  %s1003_s25 = int_to_ptr.vmem [resolvable:$false] %s1002_s25 }
  0x55   : > { %s1004_s8 = scalar_lea.vmem %s1003_s25, 256  ;;  %p1005_p13 = scmp.lt.s32.totalorder %s1389_s21, %s1003_s25 }
  0x56   : > { %p1000_p7 = pnand %p998_p4, %p984_p5  ;;  %p1006_p0 = scmp.lt.s32.totalorder %s1004_s8, %s997_s4 }
  0x58   : > { %p1001_p8 = pneg %p1000_p7  ;;  %p1007_p6 = por %p1006_p0, %p1005_p13 }
  0x5a   : > { %p1008_p9 = pnand %p1007_p6, %p1001_p8 }
  0x5c   : > { %1011 = shalt.err (!%p1008_p9)
}
  0x5d   : > { %821 = dma.hbm_to_vmem [thread:$0]  (!%p1395_p3), %s1387_s17, 128, %s1389_s21, %s204_s14  }
  0x5e   : > { %s80_s6 = sadd.s32 1, %s1156_s0  ;;  %p87_p8 = scmp.ne.s32.totalorder %s1156_s0, %s1152_s29 }
  0x5f   : > { %s1428_s12 = scalar_select %p1366_p1, %s1156_s0, %s80_s6  }
  0x60   : > { %p93_p13 = scmp.ne.s32.totalorder %s1152_s29, %s1148_s28  ;;  %s225_s13 = sand.u32 1, %s1156_s0  }
  0x61   : > { %p1618_p2 = scmp.eq.s32.totalorder %s1293_s11, 0  ;;  %s223_s24 = sand.u32 1, %s1180_s10  }
  0x62   : > { %p1620_p10 = scmp.eq.s32.totalorder %s1180_s10, 0  ;;  %s715_s4 = sshll.u32 %s225_s13, 3 }
  0x63   : > { %p1437_p5 = por %p93_p13, %p1618_p2  ;;  %s232_s18 = sadd.s32 %s1176_s9, %s1358_s16 }
  0x64   : > { %p89_p11 = por %p87_p8, %p1620_p10  ;;  %s716_s25 = sshll.u32 %s232_s18, 7 }
  0x65   : > { %s227_s17 = scalar_lea.vmem [#allocation8], %s715_s4  ;;  %s1449_s8 = scalar_lea.hbm %s1585_s3, %s716_s25 }
  0x66   : > { %s236_s21 = sshll.u32 %s227_s17, 4  ;;  %p1621_p1 = scmp.lt.s32.totalorder %s1180_s10, 2  ;;  %s1451_s21 = int_to_ptr.vmem [resolvable:$true] %s236_s21 }
  0x67   : > { %s224_s16 = scalar_lea.sflag [#allocation9], %s223_s24  ;;  %s1012_s6 = scalar_lea.hbm %s1449_s8, 128 }
  0x68   : > { %p1455_p3 = pnand %p1621_p1, %p89_p11  ;;  %p1013_p12 = scmp.ne.s32.totalorder %s1449_s8, %s1012_s6 }
  0x69   : > { %s1017_s18 = scalar_lea.hbm %s1585_s3, 256  ;;  %p1018_p6 = scmp.lt.u32.totalorder %s1449_s8, %s1585_s3 }
  0x6a   : > { %p1014_p4 = pneg %p1455_p3  ;;  %p1019_p9 = scmp.lt.u32.totalorder %s1017_s18, %s1012_s6 }
  0x6b   : > { %p1021_p13 = scmp.lt.u32.totalorder %s1012_s6, %s1449_s8 }
  0x6c   : > { %p1015_p7 = pnand %p1014_p4, %p1013_p12  ;;  %p1020_p8 = por %p1019_p9, %p1018_p6 }
  0x6e   : > { %p1016_p0 = pneg %p1015_p7  ;;  %p1022_p2 = por %p1021_p13, %p1020_p8 }
  0x70   : > { %p1023_p10 = pnand %p1022_p2, %p1016_p0 }
  0x72   : > { %1026 = shalt.err (!%p1023_p10)
}
  0x73   : > { %s1027_s24 = scalar_lea.vmem %s1451_s21, 128  ;;  %s1186_s14 = smov [#allocation8]  }
  0x74   : > { %p1028_p11 = scmp.ne.s32.totalorder %s1451_s21, %s1027_s24  ;;  %s1032_s20 = sshll.u32 %s1186_s14, 4  ;;  %s1033_s20 = int_to_ptr.vmem [resolvable:$false] %s1032_s20 }
  0x75   : > { %s1034_s13 = scalar_lea.vmem %s1033_s20, 256  ;;  %p1035_p7 = scmp.lt.s32.totalorder %s1451_s21, %s1033_s20 }
  0x76   : > { %p1030_p1 = pnand %p1028_p11, %p1014_p4  ;;  %p1036_p6 = scmp.lt.s32.totalorder %s1034_s13, %s1027_s24 }
  0x78   : > { %p1031_p12 = pneg %p1030_p1  ;;  %p1037_p9 = por %p1036_p6, %p1035_p7 }
  0x7a   : > { %p1038_p8 = pnand %p1037_p9, %p1031_p12 }
  0x7c   : > { %1041 = shalt.err (!%p1038_p8)
}
  0x7d   : > { %824 = dma.hbm_to_vmem [thread:$0]  (!%p1455_p3), %s1449_s8, 128, %s1451_s21, %s224_s16  }
  0x7e   : > { %p1623_p0 = scmp.ne.s32.totalorder %s1609_s15, 0 }
  0x7f   : > { %s247_s6 = sand.u32 (!%p1623_p0), 1, %s1164_s1   ;;  %p1624_p4 = scmp.ne.s32.totalorder (!%p1623_p0), %s1615_s19, 0 }
  0x80   : > { %245 = sbr.rel (%p1623_p0) target bundleno = 413 (0x19d), region = 36  ;;  %s718_s4 = sshll.u32 (!%p1623_p0), %s247_s6, 3 }
  0x81   : > { %s248_s18 = scalar_lea.sflag (!%p1623_p0), [#allocation6], %s247_s6  ;;  %s251_s25 = scalar_lea.vmem (!%p1623_p0), [#allocation5], %s718_s4 }
  0x87   : > { %1119 = dma.done.wait (%p1624_p4), %s248_s18, 128  }
  0x88   : > { %1121 = vsyncadd (%p1624_p4), %s248_s18, 4294967168  ;;  %s256_s28 = sand.u32 1, %s1293_s11   ;;  %s258_s17 = sand.u32 1, %s1152_s29  }
  0x89   : > { %s719_s21 = sshll.u32 %s258_s17, 3  ;;  %s257_s8 = scalar_lea.sflag [#allocation9], %s256_s28 }
  0x8a   : > { %s260_s15 = scalar_lea.vmem [#allocation8], %s719_s21 }
  0x8b   : > { %1123 = dma.done.wait (%p1437_p5), %s257_s8, 128  }
  0x8c   : > { %1125 = vsyncadd (%p1437_p5), %s257_s8, 4294967168  ;;  %p1625_p3 = scmp.eq.s32.totalorder %s1293_s11, 0 }
  0x8e   : > { %1127 = dma.done.wait (%p1625_p3), [#allocation9], 256   ;;  %p1626_p13 = pmov %p1625_p3 }
  0x8f   : > { %v304_v0 = vlaneseq  ;;  %v1187_v1 = vmov 1966171168   ;;  %v935_v6 = vld [vmem:[#allocation10] sm:$0xff]   ;;  %v936_v7 = vld [vmem:[#allocation10 + $0x8] sm:$0xff]   ;;  %v298_v15 = vld [vmem:[%s260_s15] sm:$0xff]  ;;  %vm456_vm0 = vcmask 261120  }
  0x90   : > { %1129 = vsyncadd (%p1626_p13), [#allocation9], 4294967040  ;;  %v302_v2 = vunpack.c.l.s4 %v1187_v1  ;;  %788 = vmatprep.subr.bf16.mxu0 %v935_v6  ;;  %800 = vmatprep.subr.bf16.mxu1 %v935_v6  ;;  %v297_v8 = vld [vmem:[%s251_s25] sm:$0xff]  ;;  %s291_s23 = sand.u32 1, %s1140_s26   ;;  %s1627_s16 = sld [smem:[#allocation17_spill]] }
  0x91   : > { %v305_v3 = vshrl.u32 %v304_v0, 7  ;;  %789 = vmatpush3.bf16.msra.mxu0 %v935_v6  ;;  %802 = vmatpush3.bf16.msra.mxu1 %v935_v6  ;;  %v300_v11 = vcombine.high %v297_v8, %v297_v8  ;;  %v722_v52 = vld [vmem:[%s1587_s5] ss:$0 sm:$0xff]  ;;  %s721_s24 = sshll.u32 %s291_s23, 5  ;;  %s1628_s6 = sld [smem:[#allocation18_spill]] }
  0x92   : > { %v303_v4 = vunpack.c.0.s8 %v302_v2  ;;  %790 = vmatprep.subr.bf16.mxu0 %v936_v7  ;;  %801 = vmatprep.subr.bf16.mxu1 %v936_v7  ;;  %s293_s14 = scalar_lea.vmem [#allocation11], %s721_s24  ;;  %s1629_s25 = sld [smem:[#allocation22_spill]] }
  0x93   : > { %v351_v10 = vsub.s32 0, %v305_v3  ;;  %s590_s20 = sshll.u32 %s293_s14, 4  ;;  %s1517_s21 = scalar_lea.sflag [#allocation7], %s291_s23  ;;  %s1508_s20 = int_to_ptr.vmem [resolvable:$true] %s590_s20 }
  0x94   : > { %v306_v5 = vsub.s32 %v303_v4, %v305_v3  ;;  %s1042_s8 = scalar_lea.vmem %s1508_s20, 512  ;;  %s1188_s15 = smov [#allocation11]  }
  0x95   : > { %791 = vmatpush3.bf16.msra.mxu0 %v936_v7  ;;  %803 = vmatpush3.bf16.msra.mxu1 %v936_v7  ;;  %p1043_p5 = scmp.ne.s32.totalorder %s1508_s20, %s1042_s8  ;;  %s1046_s11 = sshll.u32 %s1188_s15, 4  ;;  %s1047_s11 = int_to_ptr.vmem [resolvable:$false] %s1046_s11 }
  0x96   : > { %v307_v9 = vrot.slane %v297_v8, %v306_v5  ;;  %v314_v14 = vrot.slane %v300_v11, %v306_v5  ;;  %s758_s13 = sshll.u32 %s1627_s16, 9  ;;  %s1048_s19 = scalar_lea.vmem %s1047_s11, 1024 }
  0x97   : > { %p1631_p2 = scmp.ne.s32.totalorder %s1628_s6, 0  ;;  %p1049_p1 = scmp.lt.s32.totalorder %s1508_s20, %s1047_s11 }
  0x98   : > { %v315_v12 = vcombine.high %v307_v9, %v307_v9  ;;  %v323_v13 = vrot.slane %v307_v9, %v306_v5  ;;  %v316_v19 = vcombine.high %v314_v14, %v314_v14  ;;  %v330_v20 = vrot.slane %v314_v14, %v306_v5  ;;  %s1630_s17 = smov %s1629_s25  ;;  %s1513_s28 = scalar_lea.hbm %s1629_s25, %s758_s13 }
  0x99   : > { %p1044_p10 = pnand %p1043_p5, %p1631_p2  ;;  %p1050_p12 = scmp.lt.s32.totalorder %s1048_s19, %s1042_s8 }
  0x9a   : > { %v337_v16 = vrot.slane %v315_v12, %v306_v5  ;;  %v345_v17 = vcombine.high %v323_v13, %v323_v13  ;;  %v352_v18 = vrot.slane %v323_v13, %v351_v10  ;;  %v344_v25 = vrot.slane %v316_v19, %v306_v5 }
  0x9b   : > { %v346_v26 = vcombine.high %v330_v20, %v330_v20  ;;  %v368_v27 = vrot.slane %v330_v20, %v351_v10  ;;  %p1045_p11 = pneg %p1044_p10  ;;  %p1051_p7 = por %p1050_p12, %p1049_p1 }
  0x9c   : > { %v347_v21 = vcombine.high %v337_v16, %v337_v16  ;;  %v356_v22 = vrot.slane %v337_v16, %v351_v10  ;;  %v389_v23 = vadd.f32 %v352_v18, %v298_v15  ;;  %v360_v24 = vrot.slane %v345_v17, %v351_v10 }
  0x9d   : > { %v348_v31 = vcombine.high %v344_v25, %v344_v25  ;;  %v372_v32 = vrot.slane %v344_v25, %v351_v10  ;;  %v393_v33 = vadd.f32 %v368_v27, %v298_v15  ;;  %v376_v34 = vrot.slane %v346_v26, %v351_v10  ;;  %p1052_p6 = pnand %p1051_p7, %p1045_p11 }
  0x9e   : > { %v390_v28 = vadd.f32 %v356_v22, %v298_v15  ;;  %938 = vtanh.f32 %v389_v23  ;;  %v364_v29 = vrot.slane %v347_v21, %v351_v10  ;;  %v391_v30 = vadd.f32 %v360_v24, %v298_v15 }
  0x9f   : > { %v394_v36 = vadd.f32 %v372_v32, %v298_v15  ;;  %v380_v37 = vrot.slane %v348_v31, %v351_v10  ;;  %v395_v38 = vadd.f32 %v376_v34, %v298_v15 }
  0xa0   : > { %940 = vtanh.f32 %v390_v28  ;;  %v392_v35 = vadd.f32 %v364_v29, %v298_v15 }
  0xa1   : > { %942 = vtanh.f32 %v391_v30  ;;  %v396_v39 = vadd.f32 %v380_v37, %v298_v15 }
  0xa2   : > { %944 = vtanh.f32 %v392_v35 }
  0xa3   : > { %946 = vtanh.f32 %v393_v33 }
  0xa4   : > { %948 = vtanh.f32 %v394_v36 }
  0xa5   : > { %950 = vtanh.f32 %v395_v38 }
  0xa6   : > { %952 = vtanh.f32 %v396_v39 }
  0xa8   : > { %v939_v40 = vpop.eup %938 }
  0xaa   : > { %v941_v41 = vpop.eup %940 }
  0xab   : > { %v943_v42 = vpop.eup %942  ;;  %v746_v43 = vpack.c.bf16 %v941_v41, %v939_v40 }
  0xac   : > { %v945_v44 = vpop.eup %944 }
  0xad   : > { %v947_v45 = vpop.eup %946  ;;  %792 = vmatprep.mubr.msk.bf16.mxu0 %vm456_vm0, %v746_v43  ;;  %v747_v46 = vpack.c.bf16 %v945_v44, %v943_v42 }
  0xae   : > { %v949_v47 = vpop.eup %948 }
  0xaf   : > { %v951_v48 = vpop.eup %950  ;;  %793 = vmatmul.mubr.msk.bf16.vlgmr.msra.gmra.mrb[0].mxu0 %vm456_vm0, %v747_v46  ;;  %v748_v49 = vpack.c.bf16 %v949_v47, %v947_v45 }
  0xb0   : > { %v953_v50 = vpop.eup %952 }
  0xb1   : > { %796 = vmatprep.mubr.msk.bf16.mxu1 %vm456_vm0, %v748_v49  ;;  %v749_v51 = vpack.c.bf16 %v953_v50, %v951_v48 }
  0xb3   : > { %797 = vmatmul.mubr.msk.bf16.vlgmr.msra.gmra.mrb[0].mxu1 %vm456_vm0, %v749_v51 }
 0x182   : > { %v794_v53 = vpop.f32.mrb[0].mxu0 }
 0x183   : > { %v512_v54 = vadd.f32 %v794_v53, %v722_v52  ;;  %v503_v55 = vpop.f32.mrb[1].mxu0 }
 0x184   : > { %v504_v56 = vadd.f32 %v722_v52, %v503_v55  ;;  %v795_v57 = vpop.f32.mrb[2].mxu0 }
 0x185   : > { %v515_v58 = vadd.f32 %v795_v57, %v722_v52  ;;  %v506_v59 = vpop.f32.mrb[3].mxu0 }
 0x186   : > { %v798_v60 = vpop.f32.mrb[0].mxu1  ;;  %v507_v61 = vadd.f32 %v722_v52, %v506_v59 }
 0x187   : > { %v767_v62 = vpack.c.bf16 %v515_v58, %v512_v54  ;;  %v519_v63 = vpop.f32.mrb[1].mxu1  ;;  %v528_v2 = vadd.f32 %v798_v60, %v722_v52 }
 0x188   : > { %v762_v0 = vpack.c.bf16 %v507_v61, %v504_v56  ;;  %v799_v1 = vpop.f32.mrb[2].mxu1  ;;  %v520_v5 = vadd.f32 %v722_v52, %v519_v63 }
 0x189   : > { %779 = vst [vmem:[%s293_s14 + $0x8] sm:$0xff] %v767_v62   ;;  %v531_v3 = vadd.f32 %v799_v1, %v722_v52  ;;  %v522_v4 = vpop.f32.mrb[3].mxu1 }
 0x18a   : > { %763 = vst [vmem:[%s293_s14] sm:$0xff] %v762_v0   ;;  %v523_v6 = vadd.f32 %v722_v52, %v522_v4 }
 0x18b   : > { %v777_v7 = vpack.c.bf16 %v531_v3, %v528_v2 }
 0x18c   : > { %v772_v8 = vpack.c.bf16 %v523_v6, %v520_v5 }
 0x18d   : > { %781 = vst [vmem:[%s293_s14 + $0x18] sm:$0xff] %v777_v7  }
 0x18e   : > { %780 = vst [vmem:[%s293_s14 + $0x10] sm:$0xff] %v772_v8  }
 0x18f   : > { %1055 = shalt.err (!%p1052_p6)
}
 0x190   : > { %s1056_s23 = scalar_lea.hbm %s1513_s28, 512  ;;  %s1060_s14 = scalar_lea.hbm %s1630_s17, 1024 }
 0x191   : > { %p1057_p9 = scmp.ne.s32.totalorder %s1513_s28, %s1056_s23  ;;  %p1061_p4 = scmp.lt.u32.totalorder %s1513_s28, %s1630_s17 }
 0x192   : > { %p1062_p3 = scmp.lt.u32.totalorder %s1060_s14, %s1056_s23  ;;  %p1064_p5 = scmp.lt.u32.totalorder %s1056_s23, %s1513_s28 }
 0x193   : > { %p1058_p8 = pnand %p1057_p9, %p1631_p2 }
 0x194   : > { %p1063_p13 = por %p1062_p3, %p1061_p4 }
 0x195   : > { %p1059_p0 = pneg %p1058_p8 }
 0x196   : > { %p1065_p10 = por %p1064_p5, %p1063_p13 }
 0x198   : > { %p1066_p11 = pnand %p1065_p10, %p1059_p0 }
 0x19a   : > { %1069 = shalt.err (!%p1066_p11)
}
 0x19b   : > { %s1189_s18 = smov 64   ;;  %s1190_s25 = smov 4  }
 0x19c   : > { %812 = dma.vmem_to_hbm [thread:$0]  (%p1631_p2), %s1508_s20, 512, %s1513_s28, %s1517_s21, %s1189_s18, %s1189_s18, %s1190_s25  }
 0x19d PF: > { %s1632_s8 = sld [smem:[#allocation16_spill]]  ;;  %s1633_s15 = sld [smem:[#allocation19_spill]] }
 0x19e   : > { %p1635_p12 = scmp.ge.s32.totalorder %s1180_s10, 2 }
 0x1a3   : > { %s605_s11 = sand.u32 1, %s1632_s8   ;;  %p1634_p1 = scmp.ne.s32.totalorder %s1633_s15, 0 }
 0x1a4   : > { %s606_s19 = scalar_lea.sflag [#allocation7], %s605_s11 }
 0x1a5   : > { %p826_p7 = pnand %p1635_p12, %p1634_p1 }
 0x1a7   : > { %1131 = dma.done.wait (!%p826_p7), %s606_s19, 512  }
 0x1a8   : > { %1133 = vsyncadd (!%p826_p7), %s606_s19, 4294966784  ;;  %s27_s10 = sadd.s32 1, %s1180_s10   ;;  %s1636_s20 = smov %s1379_s30 }
 0x1a9   : > { %p24_p6 = scmp.ge.s32.totalorder %s27_s10, 4   ;;  %s1637_s6 = sld [smem:[#allocation20_spill]] }
 0x1aa   : > { %s1638_s25 = smov %s1140_s26  ;;  %s1639_s26 = smov %s1144_s27 }
 0x1ab   : > { %s1640_s27 = smov %s1374_s22  ;;  %s1641_s28 = smov %s1152_s29 }
 0x1ac   : > { %s1642_s29 = smov %s1156_s0  ;;  %s1643_s0 = smov %s1428_s12 }
 0x1ad   : > { %s1644_s30 = smov %s1164_s1  ;;  %s1645_s1 = smov %s1168_s7 }
 0x1ae   : > { %s1646_s7 = smov %s1636_s20  ;;  %s1647_s8 = smov %s1176_s9 }
 0x1af   : > { %s1648_s9 = smov %s1637_s6  ;;  %26 = sbr.rel (!%p24_p6) target bundleno = 16 (0x10), region = 98 }
 0x1b6   :  { %611 = vsyncpa [#allocation6], 1 }
 0x1b7   :  { %613 = vsyncpa [#allocation6 + $0x1], 1 }
 0x1b8   :  { %614 = vsyncpa [#allocation9], 1 }
 0x1b9   :  { %616 = vsyncpa [#allocation9 + $0x1], 1 }
 0x1ba   :  { %617 = vsyncpa [#allocation7], 1 }
 0x1bb   :  { %619 = vsyncpa [#allocation7 + $0x1], 1 }

</bundles_post_ra>
